<compile_context>
chip_gen: v7x
topology: tpu7x:2x2x1
jax: 0.10.0
libtpu: 0.0.40
codegen_flags: <defaults>
</compile_context>

<pallas_src>
import functools

import jax
import jax.numpy as jnp
from jax.experimental import pallas as pl
from jax.experimental.pallas import tpu as pltpu

# ---------------- model sizes (small, consistent with the module) -----------
VOCAB = 16      # input_size  (vocab / embedding rows)
HIDDEN = 32     # hidden_size
OUT = 16        # output_size
N_LAYERS = 1    # module default
SEQ = 8         # number of decode steps fused into one kernel call


# ------------------------------ Pallas kernel -------------------------------
def rnn_seq_kernel(gi_seq_ref,     # VMEM (T, 3H)   precomputed emb[tok] @ W_ih^T + b_ih
                   h0_ref,         # VMEM (1, H)    initial hidden state
                   w_hh_ref,       # VMEM (H, 3H)   W_hh^T
                   b_hh_ref,       # VMEM (1, 3H)
                   w_dec_ref,      # VMEM (H, OUT)  W_dec^T
                   b_dec_ref,      # VMEM (1, OUT)
                   out_ref,        # VMEM (T, OUT)  all logits, ONE store
                   h_out_ref):     # VMEM (1, H)    final hidden state
    H = h0_ref.shape[1]
    T = out_ref.shape[0]

    # Recurrent weights into vregs once; reused across every unrolled step.
    w_hh = w_hh_ref[...]
    b_hh = b_hh_ref[...]

    h = h0_ref[...].astype(jnp.float32)                                   # (1, H)
    h_steps = []

    # T is a static Python int -> full unroll; hidden state carried in vregs.
    for t in range(T):
        # Input path: static row slice of the pre-gathered gate table (not on
        # the serial h-dependency chain).
        gi = gi_seq_ref[pl.ds(t, 1), :]                                   # (1, 3H)
        # Hidden path: single small MXU matmul.
        gh = jnp.dot(h, w_hh, preferred_element_type=jnp.float32) + b_hh  # (1, 3H)

        # GRU cell, PyTorch semantics, gate order [r, z, n].
        # r and z sigmoids fused into a single EUP invocation over 2H lanes.
        s = jax.nn.sigmoid(gi[:, 0:2 * H] + gh[:, 0:2 * H])               # (1, 2H)
        r = s[:, 0:H]
        z = s[:, H:2 * H]
        n = jnp.tanh(gi[:, 2 * H:3 * H] + r * gh[:, 2 * H:3 * H])
        h = (1.0 - z) * n + z * h                                         # (1, H)
        h_steps.append(h)

    # Decoder hoisted out of the recurrence: one batched (T, H) @ (H, OUT)
    # matmul and one lane-contiguous (T, OUT) store in the epilogue.
    hs = jnp.concatenate(h_steps, axis=0)                                 # (T, H)
    logits = jnp.dot(hs, w_dec_ref[...],
                     preferred_element_type=jnp.float32) + b_dec_ref[...]  # (T, OUT)
    out_ref[...] = logits.astype(out_ref.dtype)

    h_out_ref[...] = h.astype(h_out_ref.dtype)


# ---------------------- one-time parameter preparation ----------------------
def prepare_params(params):
    """Hoisted out of the forward path: transposes, reshapes and the fused
    embedding/input-gate table (emb @ W_ih^T + b_ih) are computed once.
    The table stays 2-D (V, 3H); the kernel only ever sees the per-sequence
    pre-gathered (T, 3H) slice."""
    H = HIDDEN
    gi_tbl = (params["emb"].astype(jnp.float32)
              @ params["w_ih"].T.astype(jnp.float32)
              + params["b_ih"].reshape(1, 3 * H).astype(jnp.float32))     # (V, 3H)
    return {
        "gi_tbl": gi_tbl,                                                 # (V, 3H)
        "w_hh_t": params["w_hh"].T.astype(jnp.float32),                   # (H, 3H)
        "b_hh": params["b_hh"].reshape(1, 3 * H).astype(jnp.float32),
        "w_dec_t": params["w_dec"].T.astype(jnp.float32),                 # (H, OUT)
        "b_dec": params["b_dec"].reshape(1, OUT).astype(jnp.float32),
    }


# ------------------------------- pallas_call ---------------------------------
@functools.lru_cache(maxsize=None)
def _seq_call(T):
    H, O = HIDDEN, OUT
    full = lambda shape: pl.BlockSpec(shape, lambda i: (0, 0))

    grid_spec = pltpu.PrefetchScalarGridSpec(
        num_scalar_prefetch=0,
        grid=(1,),                        # single invocation; all blocks = full arrays
        in_specs=[
            full((T, 3 * H)),             # pre-gathered input gates per step
            full((1, H)),                 # initial hidden
            full((H, 3 * H)),             # W_hh^T
            full((1, 3 * H)),             # b_hh
            full((H, O)),                 # W_dec^T
            full((1, O)),                 # b_dec
        ],
        out_specs=[
            full((T, O)),                 # logits, one store in the epilogue
            full((1, H)),                 # final hidden
        ],
    )
    return pl.pallas_call(
        rnn_seq_kernel,
        grid_spec=grid_spec,
        out_shape=(jax.ShapeDtypeStruct((T, O), jnp.float32),
                   jax.ShapeDtypeStruct((1, H), jnp.float32)),
        compiler_params=pltpu.CompilerParams(
            dimension_semantics=("arbitrary",)),
    )


def rnn_forward_seq(tokens, hidden, prepped):
    """Fused T-step decode. tokens: (T,) int32; hidden: (N_LAYERS, 1, H) f32.
    Returns (logits (T, OUT), final hidden (N_LAYERS, 1, H))."""
    T = int(tokens.shape[0])
    # Pre-gather the fused input gates for the actual token sequence outside
    # the kernel -> removes the dynamic row read from the recurrent chain.
    gi_seq = jnp.take(prepped["gi_tbl"], tokens.astype(jnp.int32), axis=0)  # (T, 3H)
    out, h_new = _seq_call(T)(
        gi_seq,
        hidden.reshape(1, HIDDEN).astype(jnp.float32),
        prepped["w_hh_t"], prepped["b_hh"],
        prepped["w_dec_t"], prepped["b_dec"])
    return out, h_new.reshape(N_LAYERS, 1, HIDDEN)


def rnn_forward(token, hidden, prepped):
    """Single-step forward matching the module's forward(input, hidden)."""
    out, h_new = rnn_forward_seq(jnp.reshape(token, (1,)), hidden, prepped)
    return out.reshape(1, OUT), h_new


# --------------------------- pure-JAX reference ------------------------------
def gru_step_ref(token, h2d, p):
    """One application of the PyTorch module forward (batch 1)."""
    H = HIDDEN
    x = p["emb"][token].reshape(1, H)
    gi = x @ p["w_ih"].T + p["b_ih"].reshape(1, 3 * H)
    gh = h2d @ p["w_hh"].T + p["b_hh"].reshape(1, 3 * H)
    r = jax.nn.sigmoid(gi[:, :H] + gh[:, :H])
    z = jax.nn.sigmoid(gi[:, H:2 * H] + gh[:, H:2 * H])
    n = jnp.tanh(gi[:, 2 * H:] + r * gh[:, 2 * H:])
    h_new = (1.0 - z) * n + z * h2d
    out = h_new @ p["w_dec"].T + p["b_dec"].reshape(1, OUT)
    return out, h_new


# --------------------------------- main --------------------------------------
if __name__ == "__main__":
    key = jax.random.PRNGKey(0)
    ks = jax.random.split(key, 8)
    bound = 1.0 / jnp.sqrt(jnp.float32(HIDDEN))

    params = {
        # nn.Embedding default init: N(0, 1)
        "emb": jax.random.normal(ks[0], (VOCAB, HIDDEN), jnp.float32),
        # nn.GRU default init: U(-1/sqrt(H), 1/sqrt(H)), gate order [r, z, n]
        "w_ih": jax.random.uniform(ks[1], (3 * HIDDEN, HIDDEN), jnp.float32, -bound, bound),
        "w_hh": jax.random.uniform(ks[2], (3 * HIDDEN, HIDDEN), jnp.float32, -bound, bound),
        "b_ih": jax.random.uniform(ks[3], (3 * HIDDEN,), jnp.float32, -bound, bound),
        "b_hh": jax.random.uniform(ks[4], (3 * HIDDEN,), jnp.float32, -bound, bound),
        # nn.Linear default init: U(-1/sqrt(H), 1/sqrt(H))
        "w_dec": jax.random.uniform(ks[5], (OUT, HIDDEN), jnp.float32, -bound, bound),
        "b_dec": jax.random.uniform(ks[6], (OUT,), jnp.float32, -bound, bound),
    }

    tokens = jax.random.randint(ks[7], (SEQ,), 0, VOCAB, dtype=jnp.int32)
    hidden0 = jnp.zeros((N_LAYERS, 1, HIDDEN), jnp.float32)   # init_hidden()

    prepped = prepare_params(params)                          # one-time prep

    # Fused multi-step decode: ONE pallas_call for the whole token sequence.
    out_seq, h_seq = rnn_forward_seq(tokens, hidden0, prepped)
    out_seq = jax.block_until_ready(out_seq)
    h_seq = jax.block_until_ready(h_seq)

    # Single-step call matching the module's forward(input, hidden) signature.
    out1, h1 = rnn_forward(tokens[:1], hidden0, prepped)
    out1 = jax.block_until_ready(out1)
    h1 = jax.block_until_ready(h1)

    # Reference: iterate the module forward step-by-step in pure JAX.
    h_ref = hidden0.reshape(1, HIDDEN)
    outs_ref = []
    for t in range(SEQ):
        o_t, h_ref = gru_step_ref(tokens[t], h_ref, params)
        outs_ref.append(o_t)
    outs_ref = jnp.concatenate(outs_ref, axis=0)

    assert out_seq.shape == (SEQ, OUT) and h_seq.shape == (N_LAYERS, 1, HIDDEN)
    assert jnp.allclose(out_seq, outs_ref, atol=1e-4), "sequence logits mismatch"
    assert jnp.allclose(h_seq.reshape(1, HIDDEN), h_ref, atol=1e-4), "final hidden mismatch"

    o_ref1, h_ref1 = gru_step_ref(tokens[0], hidden0.reshape(1, HIDDEN), params)
    assert jnp.allclose(out1, o_ref1, atol=1e-4), "single-step output mismatch"
    assert jnp.allclose(h1.reshape(1, HIDDEN), h_ref1, atol=1e-4), "single-step hidden mismatch"

    print("KERNEL_OK")
</pallas_src>

<mosaic_0001>
module attributes {stable_mosaic.version = 11 : i64} {
  func.func @rnn_seq_kernel(%arg0: i32, %arg1: memref<8x96xf32, #tpu.memory_space<vmem>>, %arg2: memref<1x32xf32, #tpu.memory_space<vmem>>, %arg3: memref<32x96xf32, #tpu.memory_space<vmem>>, %arg4: memref<1x96xf32, #tpu.memory_space<vmem>>, %arg5: memref<32x16xf32, #tpu.memory_space<vmem>>, %arg6: memref<1x16xf32, #tpu.memory_space<vmem>>, %arg7: memref<8x16xf32, #tpu.memory_space<vmem>>, %arg8: memref<1x32xf32, #tpu.memory_space<vmem>>) attributes {dimension_semantics = [#tpu.dimension_semantics<arbitrary>], iteration_bounds = array<i64: 1>, scalar_prefetch = 0 : i64, scratch_operands = 0 : i64, tpu.core_type = #tpu.core_type<tc>, window_params = [{pipeline_mode = #tpu.pipeline_mode<synchronous>, transform_indices = @transform_0, window_bounds = array<i64: 8, 96>}, {pipeline_mode = #tpu.pipeline_mode<synchronous>, transform_indices = @transform_1, window_bounds = array<i64: 1, 32>}, {pipeline_mode = #tpu.pipeline_mode<synchronous>, transform_indices = @transform_2, window_bounds = array<i64: 32, 96>}, {pipeline_mode = #tpu.pipeline_mode<synchronous>, transform_indices = @transform_3, window_bounds = array<i64: 1, 96>}, {pipeline_mode = #tpu.pipeline_mode<synchronous>, transform_indices = @transform_4, window_bounds = array<i64: 32, 16>}, {pipeline_mode = #tpu.pipeline_mode<synchronous>, transform_indices = @transform_5, window_bounds = array<i64: 1, 16>}, {pipeline_mode = #tpu.pipeline_mode<synchronous>, transform_indices = @transform_6, window_bounds = array<i64: 8, 16>}, {pipeline_mode = #tpu.pipeline_mode<synchronous>, transform_indices = @transform_7, window_bounds = array<i64: 1, 32>}]} {
    %c0 = arith.constant 0 : index
    %c0_0 = arith.constant 0 : index
    %0 = vector.load %arg3[%c0, %c0_0] : memref<32x96xf32, #tpu.memory_space<vmem>>, vector<32x96xf32>
    %c0_1 = arith.constant 0 : index
    %c0_2 = arith.constant 0 : index
    %1 = vector.load %arg4[%c0_1, %c0_2] : memref<1x96xf32, #tpu.memory_space<vmem>>, vector<1x96xf32>
    %c0_3 = arith.constant 0 : index
    %c0_4 = arith.constant 0 : index
    %2 = vector.load %arg2[%c0_3, %c0_4] : memref<1x32xf32, #tpu.memory_space<vmem>>, vector<1x32xf32>
    %c0_5 = arith.constant 0 : index
    %c0_6 = arith.constant 0 : index
    %3 = vector.load %arg1[%c0_5, %c0_6] : memref<8x96xf32, #tpu.memory_space<vmem>>, vector<1x96xf32>
    %cst = arith.constant dense<0.000000e+00> : vector<1x96xf32>
    %4 = tpu.matmul %2, %0, %cst {dimension_numbers = #tpu.dot_dimension_numbers<[1], [0], [0], [1], [0, 0, 1, 1], [], []>} : vector<1x32xf32>, vector<32x96xf32>, vector<1x96xf32> -> vector<1x96xf32>
    %5 = arith.addf %4, %1 : vector<1x96xf32>
    %6 = vector.extract_strided_slice %3 {offsets = [0, 0], sizes = [1, 64], strides = [1, 1]} : vector<1x96xf32> to vector<1x64xf32>
    %7 = vector.extract_strided_slice %5 {offsets = [0, 0], sizes = [1, 64], strides = [1, 1]} : vector<1x96xf32> to vector<1x64xf32>
    %8 = arith.addf %6, %7 : vector<1x64xf32>
    %9 = arith.negf %8 : vector<1x64xf32>
    %10 = math.exp %9 : vector<1x64xf32>
    %cst_7 = arith.constant 1.000000e+00 : f32
    %11 = vector.broadcast %cst_7 : f32 to vector<1x64xf32>
    %12 = arith.addf %11, %10 : vector<1x64xf32>
    %13 = arith.divf %11, %12 : vector<1x64xf32>
    %14 = vector.extract_strided_slice %13 {offsets = [0, 0], sizes = [1, 32], strides = [1, 1]} : vector<1x64xf32> to vector<1x32xf32>
    %15 = vector.extract_strided_slice %13 {offsets = [0, 32], sizes = [1, 32], strides = [1, 1]} : vector<1x64xf32> to vector<1x32xf32>
    %16 = vector.extract_strided_slice %3 {offsets = [0, 64], sizes = [1, 32], strides = [1, 1]} : vector<1x96xf32> to vector<1x32xf32>
    %17 = vector.extract_strided_slice %5 {offsets = [0, 64], sizes = [1, 32], strides = [1, 1]} : vector<1x96xf32> to vector<1x32xf32>
    %18 = arith.mulf %14, %17 : vector<1x32xf32>
    %19 = arith.addf %16, %18 : vector<1x32xf32>
    %20 = math.tanh %19 : vector<1x32xf32>
    %cst_8 = arith.constant 1.000000e+00 : f32
    %21 = vector.broadcast %cst_8 : f32 to vector<1x32xf32>
    %22 = arith.subf %21, %15 : vector<1x32xf32>
    %23 = arith.mulf %22, %20 : vector<1x32xf32>
    %24 = arith.mulf %15, %2 : vector<1x32xf32>
    %25 = arith.addf %23, %24 : vector<1x32xf32>
    %c1 = arith.constant 1 : index
    %c0_9 = arith.constant 0 : index
    %26 = vector.load %arg1[%c1, %c0_9] : memref<8x96xf32, #tpu.memory_space<vmem>>, vector<1x96xf32>
    %cst_10 = arith.constant dense<0.000000e+00> : vector<1x96xf32>
    %27 = tpu.matmul %25, %0, %cst_10 {dimension_numbers = #tpu.dot_dimension_numbers<[1], [0], [0], [1], [0, 0, 1, 1], [], []>} : vector<1x32xf32>, vector<32x96xf32>, vector<1x96xf32> -> vector<1x96xf32>
    %28 = arith.addf %27, %1 : vector<1x96xf32>
    %29 = vector.extract_strided_slice %26 {offsets = [0, 0], sizes = [1, 64], strides = [1, 1]} : vector<1x96xf32> to vector<1x64xf32>
    %30 = vector.extract_strided_slice %28 {offsets = [0, 0], sizes = [1, 64], strides = [1, 1]} : vector<1x96xf32> to vector<1x64xf32>
    %31 = arith.addf %29, %30 : vector<1x64xf32>
    %32 = arith.negf %31 : vector<1x64xf32>
    %33 = math.exp %32 : vector<1x64xf32>
    %cst_11 = arith.constant 1.000000e+00 : f32
    %34 = vector.broadcast %cst_11 : f32 to vector<1x64xf32>
    %35 = arith.addf %34, %33 : vector<1x64xf32>
    %36 = arith.divf %34, %35 : vector<1x64xf32>
    %37 = vector.extract_strided_slice %36 {offsets = [0, 0], sizes = [1, 32], strides = [1, 1]} : vector<1x64xf32> to vector<1x32xf32>
    %38 = vector.extract_strided_slice %36 {offsets = [0, 32], sizes = [1, 32], strides = [1, 1]} : vector<1x64xf32> to vector<1x32xf32>
    %39 = vector.extract_strided_slice %26 {offsets = [0, 64], sizes = [1, 32], strides = [1, 1]} : vector<1x96xf32> to vector<1x32xf32>
    %40 = vector.extract_strided_slice %28 {offsets = [0, 64], sizes = [1, 32], strides = [1, 1]} : vector<1x96xf32> to vector<1x32xf32>
    %41 = arith.mulf %37, %40 : vector<1x32xf32>
    %42 = arith.addf %39, %41 : vector<1x32xf32>
    %43 = math.tanh %42 : vector<1x32xf32>
    %cst_12 = arith.constant 1.000000e+00 : f32
    %44 = vector.broadcast %cst_12 : f32 to vector<1x32xf32>
    %45 = arith.subf %44, %38 : vector<1x32xf32>
    %46 = arith.mulf %45, %43 : vector<1x32xf32>
    %47 = arith.mulf %38, %25 : vector<1x32xf32>
    %48 = arith.addf %46, %47 : vector<1x32xf32>
    %c2 = arith.constant 2 : index
    %c0_13 = arith.constant 0 : index
    %49 = vector.load %arg1[%c2, %c0_13] : memref<8x96xf32, #tpu.memory_space<vmem>>, vector<1x96xf32>
    %cst_14 = arith.constant dense<0.000000e+00> : vector<1x96xf32>
    %50 = tpu.matmul %48, %0, %cst_14 {dimension_numbers = #tpu.dot_dimension_numbers<[1], [0], [0], [1], [0, 0, 1, 1], [], []>} : vector<1x32xf32>, vector<32x96xf32>, vector<1x96xf32> -> vector<1x96xf32>
    %51 = arith.addf %50, %1 : vector<1x96xf32>
    %52 = vector.extract_strided_slice %49 {offsets = [0, 0], sizes = [1, 64], strides = [1, 1]} : vector<1x96xf32> to vector<1x64xf32>
    %53 = vector.extract_strided_slice %51 {offsets = [0, 0], sizes = [1, 64], strides = [1, 1]} : vector<1x96xf32> to vector<1x64xf32>
    %54 = arith.addf %52, %53 : vector<1x64xf32>
    %55 = arith.negf %54 : vector<1x64xf32>
    %56 = math.exp %55 : vector<1x64xf32>
    %cst_15 = arith.constant 1.000000e+00 : f32
    %57 = vector.broadcast %cst_15 : f32 to vector<1x64xf32>
    %58 = arith.addf %57, %56 : vector<1x64xf32>
    %59 = arith.divf %57, %58 : vector<1x64xf32>
    %60 = vector.extract_strided_slice %59 {offsets = [0, 0], sizes = [1, 32], strides = [1, 1]} : vector<1x64xf32> to vector<1x32xf32>
    %61 = vector.extract_strided_slice %59 {offsets = [0, 32], sizes = [1, 32], strides = [1, 1]} : vector<1x64xf32> to vector<1x32xf32>
    %62 = vector.extract_strided_slice %49 {offsets = [0, 64], sizes = [1, 32], strides = [1, 1]} : vector<1x96xf32> to vector<1x32xf32>
    %63 = vector.extract_strided_slice %51 {offsets = [0, 64], sizes = [1, 32], strides = [1, 1]} : vector<1x96xf32> to vector<1x32xf32>
    %64 = arith.mulf %60, %63 : vector<1x32xf32>
    %65 = arith.addf %62, %64 : vector<1x32xf32>
    %66 = math.tanh %65 : vector<1x32xf32>
    %cst_16 = arith.constant 1.000000e+00 : f32
    %67 = vector.broadcast %cst_16 : f32 to vector<1x32xf32>
    %68 = arith.subf %67, %61 : vector<1x32xf32>
    %69 = arith.mulf %68, %66 : vector<1x32xf32>
    %70 = arith.mulf %61, %48 : vector<1x32xf32>
    %71 = arith.addf %69, %70 : vector<1x32xf32>
    %c3 = arith.constant 3 : index
    %c0_17 = arith.constant 0 : index
    %72 = vector.load %arg1[%c3, %c0_17] : memref<8x96xf32, #tpu.memory_space<vmem>>, vector<1x96xf32>
    %cst_18 = arith.constant dense<0.000000e+00> : vector<1x96xf32>
    %73 = tpu.matmul %71, %0, %cst_18 {dimension_numbers = #tpu.dot_dimension_numbers<[1], [0], [0], [1], [0, 0, 1, 1], [], []>} : vector<1x32xf32>, vector<32x96xf32>, vector<1x96xf32> -> vector<1x96xf32>
    %74 = arith.addf %73, %1 : vector<1x96xf32>
    %75 = vector.extract_strided_slice %72 {offsets = [0, 0], sizes = [1, 64], strides = [1, 1]} : vector<1x96xf32> to vector<1x64xf32>
    %76 = vector.extract_strided_slice %74 {offsets = [0, 0], sizes = [1, 64], strides = [1, 1]} : vector<1x96xf32> to vector<1x64xf32>
    %77 = arith.addf %75, %76 : vector<1x64xf32>
    %78 = arith.negf %77 : vector<1x64xf32>
    %79 = math.exp %78 : vector<1x64xf32>
    %cst_19 = arith.constant 1.000000e+00 : f32
    %80 = vector.broadcast %cst_19 : f32 to vector<1x64xf32>
    %81 = arith.addf %80, %79 : vector<1x64xf32>
    %82 = arith.divf %80, %81 : vector<1x64xf32>
    %83 = vector.extract_strided_slice %82 {offsets = [0, 0], sizes = [1, 32], strides = [1, 1]} : vector<1x64xf32> to vector<1x32xf32>
    %84 = vector.extract_strided_slice %82 {offsets = [0, 32], sizes = [1, 32], strides = [1, 1]} : vector<1x64xf32> to vector<1x32xf32>
    %85 = vector.extract_strided_slice %72 {offsets = [0, 64], sizes = [1, 32], strides = [1, 1]} : vector<1x96xf32> to vector<1x32xf32>
    %86 = vector.extract_strided_slice %74 {offsets = [0, 64], sizes = [1, 32], strides = [1, 1]} : vector<1x96xf32> to vector<1x32xf32>
    %87 = arith.mulf %83, %86 : vector<1x32xf32>
    %88 = arith.addf %85, %87 : vector<1x32xf32>
    %89 = math.tanh %88 : vector<1x32xf32>
    %cst_20 = arith.constant 1.000000e+00 : f32
    %90 = vector.broadcast %cst_20 : f32 to vector<1x32xf32>
    %91 = arith.subf %90, %84 : vector<1x32xf32>
    %92 = arith.mulf %91, %89 : vector<1x32xf32>
    %93 = arith.mulf %84, %71 : vector<1x32xf32>
    %94 = arith.addf %92, %93 : vector<1x32xf32>
    %c4 = arith.constant 4 : index
    %c0_21 = arith.constant 0 : index
    %95 = vector.load %arg1[%c4, %c0_21] : memref<8x96xf32, #tpu.memory_space<vmem>>, vector<1x96xf32>
    %cst_22 = arith.constant dense<0.000000e+00> : vector<1x96xf32>
    %96 = tpu.matmul %94, %0, %cst_22 {dimension_numbers = #tpu.dot_dimension_numbers<[1], [0], [0], [1], [0, 0, 1, 1], [], []>} : vector<1x32xf32>, vector<32x96xf32>, vector<1x96xf32> -> vector<1x96xf32>
    %97 = arith.addf %96, %1 : vector<1x96xf32>
    %98 = vector.extract_strided_slice %95 {offsets = [0, 0], sizes = [1, 64], strides = [1, 1]} : vector<1x96xf32> to vector<1x64xf32>
    %99 = vector.extract_strided_slice %97 {offsets = [0, 0], sizes = [1, 64], strides = [1, 1]} : vector<1x96xf32> to vector<1x64xf32>
    %100 = arith.addf %98, %99 : vector<1x64xf32>
    %101 = arith.negf %100 : vector<1x64xf32>
    %102 = math.exp %101 : vector<1x64xf32>
    %cst_23 = arith.constant 1.000000e+00 : f32
    %103 = vector.broadcast %cst_23 : f32 to vector<1x64xf32>
    %104 = arith.addf %103, %102 : vector<1x64xf32>
    %105 = arith.divf %103, %104 : vector<1x64xf32>
    %106 = vector.extract_strided_slice %105 {offsets = [0, 0], sizes = [1, 32], strides = [1, 1]} : vector<1x64xf32> to vector<1x32xf32>
    %107 = vector.extract_strided_slice %105 {offsets = [0, 32], sizes = [1, 32], strides = [1, 1]} : vector<1x64xf32> to vector<1x32xf32>
    %108 = vector.extract_strided_slice %95 {offsets = [0, 64], sizes = [1, 32], strides = [1, 1]} : vector<1x96xf32> to vector<1x32xf32>
    %109 = vector.extract_strided_slice %97 {offsets = [0, 64], sizes = [1, 32], strides = [1, 1]} : vector<1x96xf32> to vector<1x32xf32>
    %110 = arith.mulf %106, %109 : vector<1x32xf32>
    %111 = arith.addf %108, %110 : vector<1x32xf32>
    %112 = math.tanh %111 : vector<1x32xf32>
    %cst_24 = arith.constant 1.000000e+00 : f32
    %113 = vector.broadcast %cst_24 : f32 to vector<1x32xf32>
    %114 = arith.subf %113, %107 : vector<1x32xf32>
    %115 = arith.mulf %114, %112 : vector<1x32xf32>
    %116 = arith.mulf %107, %94 : vector<1x32xf32>
    %117 = arith.addf %115, %116 : vector<1x32xf32>
    %c5 = arith.constant 5 : index
    %c0_25 = arith.constant 0 : index
    %118 = vector.load %arg1[%c5, %c0_25] : memref<8x96xf32, #tpu.memory_space<vmem>>, vector<1x96xf32>
    %cst_26 = arith.constant dense<0.000000e+00> : vector<1x96xf32>
    %119 = tpu.matmul %117, %0, %cst_26 {dimension_numbers = #tpu.dot_dimension_numbers<[1], [0], [0], [1], [0, 0, 1, 1], [], []>} : vector<1x32xf32>, vector<32x96xf32>, vector<1x96xf32> -> vector<1x96xf32>
    %120 = arith.addf %119, %1 : vector<1x96xf32>
    %121 = vector.extract_strided_slice %118 {offsets = [0, 0], sizes = [1, 64], strides = [1, 1]} : vector<1x96xf32> to vector<1x64xf32>
    %122 = vector.extract_strided_slice %120 {offsets = [0, 0], sizes = [1, 64], strides = [1, 1]} : vector<1x96xf32> to vector<1x64xf32>
    %123 = arith.addf %121, %122 : vector<1x64xf32>
    %124 = arith.negf %123 : vector<1x64xf32>
    %125 = math.exp %124 : vector<1x64xf32>
    %cst_27 = arith.constant 1.000000e+00 : f32
    %126 = vector.broadcast %cst_27 : f32 to vector<1x64xf32>
    %127 = arith.addf %126, %125 : vector<1x64xf32>
    %128 = arith.divf %126, %127 : vector<1x64xf32>
    %129 = vector.extract_strided_slice %128 {offsets = [0, 0], sizes = [1, 32], strides = [1, 1]} : vector<1x64xf32> to vector<1x32xf32>
    %130 = vector.extract_strided_slice %128 {offsets = [0, 32], sizes = [1, 32], strides = [1, 1]} : vector<1x64xf32> to vector<1x32xf32>
    %131 = vector.extract_strided_slice %118 {offsets = [0, 64], sizes = [1, 32], strides = [1, 1]} : vector<1x96xf32> to vector<1x32xf32>
    %132 = vector.extract_strided_slice %120 {offsets = [0, 64], sizes = [1, 32], strides = [1, 1]} : vector<1x96xf32> to vector<1x32xf32>
    %133 = arith.mulf %129, %132 : vector<1x32xf32>
    %134 = arith.addf %131, %133 : vector<1x32xf32>
    %135 = math.tanh %134 : vector<1x32xf32>
    %cst_28 = arith.constant 1.000000e+00 : f32
    %136 = vector.broadcast %cst_28 : f32 to vector<1x32xf32>
    %137 = arith.subf %136, %130 : vector<1x32xf32>
    %138 = arith.mulf %137, %135 : vector<1x32xf32>
    %139 = arith.mulf %130, %117 : vector<1x32xf32>
    %140 = arith.addf %138, %139 : vector<1x32xf32>
    %c6 = arith.constant 6 : index
    %c0_29 = arith.constant 0 : index
    %141 = vector.load %arg1[%c6, %c0_29] : memref<8x96xf32, #tpu.memory_space<vmem>>, vector<1x96xf32>
    %cst_30 = arith.constant dense<0.000000e+00> : vector<1x96xf32>
    %142 = tpu.matmul %140, %0, %cst_30 {dimension_numbers = #tpu.dot_dimension_numbers<[1], [0], [0], [1], [0, 0, 1, 1], [], []>} : vector<1x32xf32>, vector<32x96xf32>, vector<1x96xf32> -> vector<1x96xf32>
    %143 = arith.addf %142, %1 : vector<1x96xf32>
    %144 = vector.extract_strided_slice %141 {offsets = [0, 0], sizes = [1, 64], strides = [1, 1]} : vector<1x96xf32> to vector<1x64xf32>
    %145 = vector.extract_strided_slice %143 {offsets = [0, 0], sizes = [1, 64], strides = [1, 1]} : vector<1x96xf32> to vector<1x64xf32>
    %146 = arith.addf %144, %145 : vector<1x64xf32>
    %147 = arith.negf %146 : vector<1x64xf32>
    %148 = math.exp %147 : vector<1x64xf32>
    %cst_31 = arith.constant 1.000000e+00 : f32
    %149 = vector.broadcast %cst_31 : f32 to vector<1x64xf32>
    %150 = arith.addf %149, %148 : vector<1x64xf32>
    %151 = arith.divf %149, %150 : vector<1x64xf32>
    %152 = vector.extract_strided_slice %151 {offsets = [0, 0], sizes = [1, 32], strides = [1, 1]} : vector<1x64xf32> to vector<1x32xf32>
    %153 = vector.extract_strided_slice %151 {offsets = [0, 32], sizes = [1, 32], strides = [1, 1]} : vector<1x64xf32> to vector<1x32xf32>
    %154 = vector.extract_strided_slice %141 {offsets = [0, 64], sizes = [1, 32], strides = [1, 1]} : vector<1x96xf32> to vector<1x32xf32>
    %155 = vector.extract_strided_slice %143 {offsets = [0, 64], sizes = [1, 32], strides = [1, 1]} : vector<1x96xf32> to vector<1x32xf32>
    %156 = arith.mulf %152, %155 : vector<1x32xf32>
    %157 = arith.addf %154, %156 : vector<1x32xf32>
    %158 = math.tanh %157 : vector<1x32xf32>
    %cst_32 = arith.constant 1.000000e+00 : f32
    %159 = vector.broadcast %cst_32 : f32 to vector<1x32xf32>
    %160 = arith.subf %159, %153 : vector<1x32xf32>
    %161 = arith.mulf %160, %158 : vector<1x32xf32>
    %162 = arith.mulf %153, %140 : vector<1x32xf32>
    %163 = arith.addf %161, %162 : vector<1x32xf32>
    %c7 = arith.constant 7 : index
    %c0_33 = arith.constant 0 : index
    %164 = vector.load %arg1[%c7, %c0_33] : memref<8x96xf32, #tpu.memory_space<vmem>>, vector<1x96xf32>
    %cst_34 = arith.constant dense<0.000000e+00> : vector<1x96xf32>
    %165 = tpu.matmul %163, %0, %cst_34 {dimension_numbers = #tpu.dot_dimension_numbers<[1], [0], [0], [1], [0, 0, 1, 1], [], []>} : vector<1x32xf32>, vector<32x96xf32>, vector<1x96xf32> -> vector<1x96xf32>
    %166 = arith.addf %165, %1 : vector<1x96xf32>
    %167 = vector.extract_strided_slice %164 {offsets = [0, 0], sizes = [1, 64], strides = [1, 1]} : vector<1x96xf32> to vector<1x64xf32>
    %168 = vector.extract_strided_slice %166 {offsets = [0, 0], sizes = [1, 64], strides = [1, 1]} : vector<1x96xf32> to vector<1x64xf32>
    %169 = arith.addf %167, %168 : vector<1x64xf32>
    %170 = arith.negf %169 : vector<1x64xf32>
    %171 = math.exp %170 : vector<1x64xf32>
    %cst_35 = arith.constant 1.000000e+00 : f32
    %172 = vector.broadcast %cst_35 : f32 to vector<1x64xf32>
    %173 = arith.addf %172, %171 : vector<1x64xf32>
    %174 = arith.divf %172, %173 : vector<1x64xf32>
    %175 = vector.extract_strided_slice %174 {offsets = [0, 0], sizes = [1, 32], strides = [1, 1]} : vector<1x64xf32> to vector<1x32xf32>
    %176 = vector.extract_strided_slice %174 {offsets = [0, 32], sizes = [1, 32], strides = [1, 1]} : vector<1x64xf32> to vector<1x32xf32>
    %177 = vector.extract_strided_slice %164 {offsets = [0, 64], sizes = [1, 32], strides = [1, 1]} : vector<1x96xf32> to vector<1x32xf32>
    %178 = vector.extract_strided_slice %166 {offsets = [0, 64], sizes = [1, 32], strides = [1, 1]} : vector<1x96xf32> to vector<1x32xf32>
    %179 = arith.mulf %175, %178 : vector<1x32xf32>
    %180 = arith.addf %177, %179 : vector<1x32xf32>
    %181 = math.tanh %180 : vector<1x32xf32>
    %cst_36 = arith.constant 1.000000e+00 : f32
    %182 = vector.broadcast %cst_36 : f32 to vector<1x32xf32>
    %183 = arith.subf %182, %176 : vector<1x32xf32>
    %184 = arith.mulf %183, %181 : vector<1x32xf32>
    %185 = arith.mulf %176, %163 : vector<1x32xf32>
    %186 = arith.addf %184, %185 : vector<1x32xf32>
    %187 = tpu.concatenate %25, %48, %71, %94, %117, %140, %163, %186 in 0 : vector<1x32xf32>, vector<1x32xf32>, vector<1x32xf32>, vector<1x32xf32>, vector<1x32xf32>, vector<1x32xf32>, vector<1x32xf32>, vector<1x32xf32> -> vector<8x32xf32>
    %c0_37 = arith.constant 0 : index
    %c0_38 = arith.constant 0 : index
    %188 = vector.load %arg5[%c0_37, %c0_38] : memref<32x16xf32, #tpu.memory_space<vmem>>, vector<32x16xf32>
    %cst_39 = arith.constant dense<0.000000e+00> : vector<8x16xf32>
    %189 = tpu.matmul %187, %188, %cst_39 {dimension_numbers = #tpu.dot_dimension_numbers<[1], [0], [0], [1], [0, 0, 1, 1], [], []>} : vector<8x32xf32>, vector<32x16xf32>, vector<8x16xf32> -> vector<8x16xf32>
    %c0_40 = arith.constant 0 : index
    %c0_41 = arith.constant 0 : index
    %190 = vector.load %arg6[%c0_40, %c0_41] : memref<1x16xf32, #tpu.memory_space<vmem>>, vector<1x16xf32>
    %191 = vector.broadcast %190 : vector<1x16xf32> to vector<8x16xf32>
    %192 = arith.addf %189, %191 : vector<8x16xf32>
    %c0_42 = arith.constant 0 : index
    %c0_43 = arith.constant 0 : index
    %193 = vector.load %arg7[%c0_42, %c0_43] : memref<8x16xf32, #tpu.memory_space<vmem>>, vector<8x16xf32>
    tpu.vector_store %arg7[%c0_42, %c0_43], %192 {strides = array<i32>} : memref<8x16xf32, #tpu.memory_space<vmem>>, vector<8x16xf32>,
    %c0_44 = arith.constant 0 : index
    %c0_45 = arith.constant 0 : index
    %194 = vector.load %arg8[%c0_44, %c0_45] : memref<1x32xf32, #tpu.memory_space<vmem>>, vector<1x32xf32>
    tpu.vector_store %arg8[%c0_44, %c0_45], %186 {strides = array<i32>} : memref<1x32xf32, #tpu.memory_space<vmem>>, vector<1x32xf32>,
    return
  }
  func.func @transform_0(%arg0: i32) -> (i32, i32) {
    %c0_i32 = arith.constant 0 : i32
    %c0_i32_0 = arith.constant 0 : i32
    %c0_i32_1 = arith.constant 0 : i32
    return %c0_i32, %c0_i32_0 : i32, i32
  }
  func.func @transform_1(%arg0: i32) -> (i32, i32) {
    %c0_i32 = arith.constant 0 : i32
    %c0_i32_0 = arith.constant 0 : i32
    %c0_i32_1 = arith.constant 0 : i32
    return %c0_i32, %c0_i32_0 : i32, i32
  }
  func.func @transform_2(%arg0: i32) -> (i32, i32) {
    %c0_i32 = arith.constant 0 : i32
    %c0_i32_0 = arith.constant 0 : i32
    %c0_i32_1 = arith.constant 0 : i32
    return %c0_i32, %c0_i32_0 : i32, i32
  }
  func.func @transform_3(%arg0: i32) -> (i32, i32) {
    %c0_i32 = arith.constant 0 : i32
    %c0_i32_0 = arith.constant 0 : i32
    %c0_i32_1 = arith.constant 0 : i32
    return %c0_i32, %c0_i32_0 : i32, i32
  }
  func.func @transform_4(%arg0: i32) -> (i32, i32) {
    %c0_i32 = arith.constant 0 : i32
    %c0_i32_0 = arith.constant 0 : i32
    %c0_i32_1 = arith.constant 0 : i32
    return %c0_i32, %c0_i32_0 : i32, i32
  }
  func.func @transform_5(%arg0: i32) -> (i32, i32) {
    %c0_i32 = arith.constant 0 : i32
    %c0_i32_0 = arith.constant 0 : i32
    %c0_i32_1 = arith.constant 0 : i32
    return %c0_i32, %c0_i32_0 : i32, i32
  }
  func.func @transform_6(%arg0: i32) -> (i32, i32) {
    %c0_i32 = arith.constant 0 : i32
    %c0_i32_0 = arith.constant 0 : i32
    %c0_i32_1 = arith.constant 0 : i32
    return %c0_i32, %c0_i32_0 : i32, i32
  }
  func.func @transform_7(%arg0: i32) -> (i32, i32) {
    %c0_i32 = arith.constant 0 : i32
    %c0_i32_0 = arith.constant 0 : i32
    %c0_i32_1 = arith.constant 0 : i32
    return %c0_i32, %c0_i32_0 : i32, i32
  }
}

</mosaic_0001>

<bundles_post_ra>
// kernel: tpu_custom_call.1
= control target key start
LH: loop header
LB: loop body
LE: loop exit
PB: predicated region body
PF: predicated region fallthrough
CT: control target
= control target key end

     0   :  { %13 = vsyncpa [#allocation3], 0  ;;  %v1325_v3 = vmov 0.0|0.0   ;;  %vm1326_vm0 = vmmov 0   ;;  %v1327_v6 = vmov 0.0   ;;  %s1592_s0 = inlined_call_operand.vmem [shape: f32[8,96], index: 0, kind: input, shape index: {}]   ;;  %s1593_s1 = inlined_call_operand.vmem [shape: f32[1,32], index: 1, kind: input, shape index: {}]   ;;  %s1594_s2 = inlined_call_operand.vmem [shape: f32[32,96], index: 2, kind: input, shape index: {}]   ;;  %s1595_s3 = inlined_call_operand.vmem [shape: f32[1,96], index: 3, kind: input, shape index: {}]   ;;  %s1596_s4 = inlined_call_operand.vmem [shape: f32[32,16], index: 4, kind: input, shape index: {}]   ;;  %s1597_s5 = inlined_call_operand.vmem [shape: f32[1,16], index: 5, kind: input, shape index: {}]   ;;  %s1598_s6 = inlined_call_operand.hbm [shape: f32[8,16], index: 6, kind: output, shape index: {0}]   ;;  %s1599_s7 = inlined_call_operand.hbm [shape: f32[1,32], index: 7, kind: output, shape index: {1}]  }
   0x1   :  { %v27_v0 = vld [vmem:[%s1594_s2] sm:$0xff]  ;;  %v28_v1 = vld [vmem:[%s1594_s2 + $0x8] sm:$0xff]  ;;  %v29_v2 = vld [vmem:[%s1594_s2 + $0x10] sm:$0xff]  ;;  %1167 = vmatprep.subr.bf16.mxu0 %v1325_v3  ;;  %1076 = vmatprep.mubr.msk.f32.mxu0 %vm1326_vm0, %v1327_v6 }
   0x2   :  { %v1383_v4 = vpack.c.bf16 %v28_v1, %v27_v0  ;;  %v30_v5 = vld [vmem:[%s1594_s2 + $0x18] sm:$0xff]  ;;  %1173 = vmatprep.subr.bf16.mxu1 %v1325_v3  ;;  %1087 = vmatprep.mubr.msk.f32.mxu1 %vm1326_vm0, %v1327_v6 }
   0x3   :  { %14 = vsyncpa [#allocation5], 0  ;;  %v1394_v7 = vpack.c.bf16 %v30_v5, %v29_v2  ;;  %v32_v8 = vld [vmem:[%s1593_s1] sm:$0x1]  ;;  %vm34_vm1 = vcmask 261120   ;;  %s1328_s11 = smov 64   ;;  %v132_v23 = vlaneseq }
   0x4   :  { %1169 = vmatpush3.bf16.msra.mxu0 %v1383_v4  ;;  %1175 = vmatpush3.bf16.msra.mxu1 %v1383_v4  ;;  %v1416_v9 = vld [vmem:[%s1595_s3] sm:$0x1]  ;;  %s1329_s3 = smov 96   ;;  %s1330_s14 = smov 32   ;;  %v141_v38 = vld [vmem:[%s1592_s0 + $0x1] sm:$0x1] }
   0x5   :  { %1170 = vmatprep.subr.bf16.mxu0 %v1325_v3  ;;  %1176 = vmatprep.subr.bf16.mxu1 %v1325_v3  ;;  %v33_v13 = vld [vmem:[%s1592_s0] sm:$0x1]  ;;  %v133_v24 = vshrl.u32 %v132_v23, 7  ;;  %v243_v58 = vld [vmem:[%s1592_s0 + $0x2] sm:$0x1]  ;;  %vm870_vm2 = vcmask 1040384  }
   0x6   :  { %vm872_vm3 = vcmask 1041408   ;;  %vm874_vm4 = vcmask 1042432   ;;  %vm876_vm5 = vcmask 1043456   ;;  %vm878_vm6 = vcmask 1044480  }
   0x7   :  { %v134_v25 = vsub.s32 0, %v133_v24  ;;  %vm880_vm7 = vcmask 1045504   ;;  %vm882_vm8 = vcmask 1046528   ;;  %vm975_vm9 = vcmask 253952  }
   0x8   :  { %1172 = vmatpush3.bf16.msra.mxu0 %v1394_v7  ;;  %1178 = vmatpush3.bf16.msra.mxu1 %v1394_v7 }
   0x9   :  { %1179 = vmatprep.subr.bf16.mxu0 %v1325_v3  ;;  %1185 = vmatprep.subr.bf16.mxu1 %v1325_v3  ;;  %v135_v27 = vrot.slane %v32_v8, %v134_v25 }
   0xb   :  { %1077 = vmatmul.mubr.msk.f32.vlgmr.msra.gmra.mrb[0].mxu0 %vm34_vm1, %v32_v8 }
   0xc   :  { %1181 = vmatpush3.bf16.msra.mxu0 %v1383_v4  ;;  %1098 = vmatprep.mubr.msk.f32.mxu0 %vm1326_vm0, %v1327_v6 }
   0xd   :  { %1182 = vmatprep.subr.bf16.mxu0 %v1325_v3 }
  0x10   :  { %1184 = vmatpush3.bf16.msra.mxu0 %v1394_v7 }
  0x11   :  { %1191 = vmatprep.subr.bf16.mxu0 %v1325_v3 }
  0xde   :  { %v104_v10 = vpop.f32.mrb[0].mxu0 }
  0xdf   :  { %v105_v11 = vadd.f32 %v104_v10, %v1416_v9  ;;  %v1078_v12 = vpop.f32.mrb[1].mxu0 }
  0xe1   :  { %116 = vrot.lane.b32.xlu0 %v105_v11, %s1328_s11  ;;  %v108_v14 = vadd.f32 %v105_v11, %v33_v13 }
  0xe3   :  { %v1006_v15 = vmul.f32 -1.442695, %v108_v14 }
  0xe5   :  { %1229 = vpow2.f32 %v1006_v15 }
  0xef   :  { %v1230_v16 = vpop.eup %1229 }
  0xf0   :  { %v112_v17 = vadd.f32 1.0, %v1230_v16 }
  0xf2   :  { %1231 = vrcp.f32 %v112_v17 }
  0xfc   :  { %v1232_v18 = vpop.eup %1231 }
  0xfd   :  { %v126_v29 = vsub.f32 1.0, %v1232_v18 }
 0x153   :  { %v117_v19 = vpop.permute.xlu0 %116 }
 0x154   :  { %v119_v20 = vmul.f32 %v1232_v18, %v117_v19  ;;  %v345_v19 = vld [vmem:[%s1592_s0 + $0x3] sm:$0x1] }
 0x156   :  { %121 = vrot.lane.b32.xlu0 %v119_v20, %s1328_s11 }
 0x1c8   :  { %v122_v21 = vpop.permute.xlu0 %121 }
 0x1c9   :  { %v124_v22 = vadd.f32 %v122_v21, %v33_v13 }
 0x1cb   :  { %1233 = vtanh.f32 %v124_v22 }
 0x1d5   :  { %v1234_v26 = vpop.eup %1233 }
 0x1d6   :  { %128 = vrot.lane.b32.xlu1 %v1234_v26, %s1329_s3 }
 0x1da   :  { %136 = vrot.lane.b32.xlu1 %v135_v27, %s1330_s14 }
 0x248   :  { %v129_v28 = vpop.permute.xlu1 %128 }
 0x249   :  { %v131_v31 = vmul.f32 %v129_v28, %v126_v29 }
 0x24c   :  { %v137_v30 = vpop.permute.xlu1 %136 }
 0x24d   :  { %v139_v32 = vmul.f32 %v1232_v18, %v137_v30 }
 0x24f   :  { %v1425_v33 = vadd.f32 %v139_v32, %v131_v31 }
 0x251   :  { %143 = vrot.lane.b32.xlu0 %v1425_v33, %s1329_s3 }
 0x2c3   :  { %v144_v34 = vpop.permute.xlu0 %143 }
 0x2c4   :  { %1088 = vmatmul.mubr.msk.f32.vlgmr.msra.gmra.mrb[0].mxu1 %vm34_vm1, %v144_v34 }
 0x2c5   :  { %1187 = vmatpush3.bf16.msra.mxu1 %v1383_v4  ;;  %1109 = vmatprep.mubr.msk.f32.mxu1 %vm1326_vm0, %v1327_v6 }
 0x2c6   :  { %1188 = vmatprep.subr.bf16.mxu1 %v1325_v3 }
 0x2c9   :  { %1190 = vmatpush3.bf16.msra.mxu1 %v1394_v7 }
 0x2ca   :  { %1197 = vmatprep.subr.bf16.mxu1 %v1325_v3 }
 0x397   :  { %v213_v35 = vpop.f32.mrb[0].mxu1 }
 0x398   :  { %v214_v36 = vadd.f32 %v213_v35, %v1416_v9  ;;  %v1089_v37 = vpop.f32.mrb[1].mxu1 }
 0x39a   :  { %225 = vrot.lane.b32.xlu1 %v214_v36, %s1328_s11  ;;  %v217_v39 = vadd.f32 %v214_v36, %v141_v38 }
 0x39c   :  { %v1008_v40 = vmul.f32 -1.442695, %v217_v39 }
 0x39e   :  { %1235 = vpow2.f32 %v1008_v40  ;;  %v447_v40 = vld [vmem:[%s1592_s0 + $0x4] sm:$0x1] }
 0x3a8   :  { %v1236_v41 = vpop.eup %1235 }
 0x3a9   :  { %v221_v42 = vadd.f32 1.0, %v1236_v41 }
 0x3ab   :  { %1237 = vrcp.f32 %v221_v42 }
 0x3b5   :  { %v1238_v43 = vpop.eup %1237 }
 0x3b6   :  { %v235_v49 = vsub.f32 1.0, %v1238_v43  ;;  %v241_v51 = vmul.f32 %v1238_v43, %v1425_v33 }
 0x40c   :  { %v226_v44 = vpop.permute.xlu1 %225 }
 0x40d   :  { %v228_v45 = vmul.f32 %v1238_v43, %v226_v44 }
 0x40f   :  { %230 = vrot.lane.b32.xlu0 %v228_v45, %s1328_s11 }
 0x481   :  { %v231_v46 = vpop.permute.xlu0 %230 }
 0x482   :  { %v233_v47 = vadd.f32 %v231_v46, %v141_v38 }
 0x484   :  { %1239 = vtanh.f32 %v233_v47 }
 0x48e   :  { %v1240_v48 = vpop.eup %1239 }
 0x48f   :  { %237 = vrot.lane.b32.xlu1 %v1240_v48, %s1329_s3 }
 0x501   :  { %v238_v50 = vpop.permute.xlu1 %237 }
 0x502   :  { %v240_v52 = vmul.f32 %v238_v50, %v235_v49 }
 0x504   :  { %v1444_v53 = vadd.f32 %v241_v51, %v240_v52 }
 0x506   :  { %245 = vrot.lane.b32.xlu0 %v1444_v53, %s1329_s3 }
 0x578   :  { %v246_v54 = vpop.permute.xlu0 %245 }
 0x579   :  { %1099 = vmatmul.mubr.msk.f32.vlgmr.msra.gmra.mrb[2].mxu0 %vm34_vm1, %v246_v54 }
 0x57a   :  { %1193 = vmatpush3.bf16.msra.mxu0 %v1383_v4  ;;  %1120 = vmatprep.mubr.msk.f32.mxu0 %vm1326_vm0, %v1327_v6 }
 0x57b   :  { %1194 = vmatprep.subr.bf16.mxu0 %v1325_v3 }
 0x57e   :  { %1196 = vmatpush3.bf16.msra.mxu0 %v1394_v7 }
 0x57f   :  { %1203 = vmatprep.subr.bf16.mxu0 %v1325_v3 }
 0x64c   :  { %v315_v55 = vpop.f32.mrb[2].mxu0 }
 0x64d   :  { %v316_v56 = vadd.f32 %v315_v55, %v1416_v9  ;;  %v1100_v57 = vpop.f32.mrb[3].mxu0 }
 0x64f   :  { %327 = vrot.lane.b32.xlu1 %v316_v56, %s1328_s11  ;;  %v319_v59 = vadd.f32 %v316_v56, %v243_v58 }
 0x651   :  { %v1010_v60 = vmul.f32 -1.442695, %v319_v59 }
 0x653   :  { %1241 = vpow2.f32 %v1010_v60 }
 0x65d   :  { %v1242_v61 = vpop.eup %1241 }
 0x65e   :  { %v323_v62 = vadd.f32 1.0, %v1242_v61  ;;  %v549_v61 = vld [vmem:[%s1592_s0 + $0x5] sm:$0x1] }
 0x660   :  { %1243 = vrcp.f32 %v323_v62 }
 0x66a   :  { %v1244_v63 = vpop.eup %1243 }
 0x66b   :  { %v337_v10 = vsub.f32 1.0, %v1244_v63  ;;  %v343_v12 = vmul.f32 %v1244_v63, %v1444_v53 }
 0x6c1   :  { %v328_v0 = vpop.permute.xlu1 %327 }
 0x6c2   :  { %v330_v1 = vmul.f32 %v1244_v63, %v328_v0 }
 0x6c4   :  { %332 = vrot.lane.b32.xlu0 %v330_v1, %s1328_s11 }
 0x736   :  { %v333_v2 = vpop.permute.xlu0 %332 }
 0x737   :  { %v335_v5 = vadd.f32 %v333_v2, %v243_v58 }
 0x739   :  { %1245 = vtanh.f32 %v335_v5 }
 0x743   :  { %v1246_v8 = vpop.eup %1245 }
 0x744   :  { %339 = vrot.lane.b32.xlu1 %v1246_v8, %s1329_s3 }
 0x7b6   :  { %v340_v11 = vpop.permute.xlu1 %339 }
 0x7b7   :  { %v342_v13 = vmul.f32 %v340_v11, %v337_v10 }
 0x7b9   :  { %v1463_v14 = vadd.f32 %v343_v12, %v342_v13 }
 0x7bb   :  { %347 = vrot.lane.b32.xlu0 %v1463_v14, %s1329_s3 }
 0x82d   :  { %v348_v15 = vpop.permute.xlu0 %347 }
 0x82e   :  { %1110 = vmatmul.mubr.msk.f32.vlgmr.msra.gmra.mrb[2].mxu1 %vm34_vm1, %v348_v15 }
 0x82f   :  { %1199 = vmatpush3.bf16.msra.mxu1 %v1383_v4  ;;  %1131 = vmatprep.mubr.msk.f32.mxu1 %vm1326_vm0, %v1327_v6 }
 0x830   :  { %1200 = vmatprep.subr.bf16.mxu1 %v1325_v3 }
 0x833   :  { %1202 = vmatpush3.bf16.msra.mxu1 %v1394_v7 }
 0x834   :  { %1209 = vmatprep.subr.bf16.mxu1 %v1325_v3 }
 0x901   :  { %v417_v16 = vpop.f32.mrb[2].mxu1 }
 0x902   :  { %v418_v17 = vadd.f32 %v417_v16, %v1416_v9  ;;  %v1111_v18 = vpop.f32.mrb[3].mxu1 }
 0x904   :  { %429 = vrot.lane.b32.xlu1 %v418_v17, %s1328_s11  ;;  %v421_v20 = vadd.f32 %v418_v17, %v345_v19 }
 0x906   :  { %v1012_v21 = vmul.f32 -1.442695, %v421_v20 }
 0x908   :  { %1247 = vpow2.f32 %v1012_v21  ;;  %v651_v21 = vld [vmem:[%s1592_s0 + $0x6] sm:$0x1] }
 0x912   :  { %v1248_v22 = vpop.eup %1247 }
 0x913   :  { %v425_v23 = vadd.f32 1.0, %v1248_v22 }
 0x915   :  { %1249 = vrcp.f32 %v425_v23 }
 0x91f   :  { %v1250_v24 = vpop.eup %1249 }
 0x920   :  { %v439_v30 = vsub.f32 1.0, %v1250_v24  ;;  %v445_v32 = vmul.f32 %v1250_v24, %v1463_v14 }
 0x976   :  { %v430_v25 = vpop.permute.xlu1 %429 }
 0x977   :  { %v432_v26 = vmul.f32 %v1250_v24, %v430_v25 }
 0x979   :  { %434 = vrot.lane.b32.xlu0 %v432_v26, %s1328_s11 }
 0x9eb   :  { %v435_v27 = vpop.permute.xlu0 %434 }
 0x9ec   :  { %v437_v28 = vadd.f32 %v435_v27, %v345_v19 }
 0x9ee   :  { %1251 = vtanh.f32 %v437_v28 }
 0x9f8   :  { %v1252_v29 = vpop.eup %1251 }
 0x9f9   :  { %441 = vrot.lane.b32.xlu1 %v1252_v29, %s1329_s3 }
 0xa6b   :  { %v442_v31 = vpop.permute.xlu1 %441 }
 0xa6c   :  { %v444_v34 = vmul.f32 %v442_v31, %v439_v30 }
 0xa6e   :  { %v1482_v35 = vadd.f32 %v445_v32, %v444_v34 }
 0xa70   :  { %449 = vrot.lane.b32.xlu0 %v1482_v35, %s1329_s3 }
 0xae2   :  { %v450_v36 = vpop.permute.xlu0 %449 }
 0xae3   :  { %1121 = vmatmul.mubr.msk.f32.vlgmr.msra.gmra.mrb[4].mxu0 %vm34_vm1, %v450_v36 }
 0xae4   :  { %1205 = vmatpush3.bf16.msra.mxu0 %v1383_v4  ;;  %1142 = vmatprep.mubr.msk.f32.mxu0 %vm1326_vm0, %v1327_v6 }
 0xae5   :  { %1206 = vmatprep.subr.bf16.mxu0 %v1325_v3 }
 0xae8   :  { %1208 = vmatpush3.bf16.msra.mxu0 %v1394_v7 }
 0xae9   :  { %1215 = vmatprep.subr.bf16.mxu0 %v1325_v3 }
 0xbb6   :  { %v519_v37 = vpop.f32.mrb[4].mxu0 }
 0xbb7   :  { %v520_v38 = vadd.f32 %v519_v37, %v1416_v9  ;;  %v1122_v39 = vpop.f32.mrb[5].mxu0 }
 0xbb9   :  { %531 = vrot.lane.b32.xlu1 %v520_v38, %s1328_s11  ;;  %v523_v41 = vadd.f32 %v520_v38, %v447_v40 }
 0xbbb   :  { %v1014_v42 = vmul.f32 -1.442695, %v523_v41 }
 0xbbd   :  { %1253 = vpow2.f32 %v1014_v42  ;;  %v753_v42 = vld [vmem:[%s1592_s0 + $0x7] sm:$0x1] }
 0xbc7   :  { %v1254_v43 = vpop.eup %1253 }
 0xbc8   :  { %v527_v44 = vadd.f32 1.0, %v1254_v43 }
 0xbca   :  { %1255 = vrcp.f32 %v527_v44 }
 0xbd4   :  { %v1256_v45 = vpop.eup %1255 }
 0xbd5   :  { %v541_v51 = vsub.f32 1.0, %v1256_v45  ;;  %v547_v54 = vmul.f32 %v1256_v45, %v1482_v35 }
 0xc2b   :  { %v532_v46 = vpop.permute.xlu1 %531 }
 0xc2c   :  { %v534_v47 = vmul.f32 %v1256_v45, %v532_v46 }
 0xc2e   :  { %536 = vrot.lane.b32.xlu0 %v534_v47, %s1328_s11 }
 0xca0   :  { %v537_v48 = vpop.permute.xlu0 %536 }
 0xca1   :  { %v539_v49 = vadd.f32 %v537_v48, %v447_v40 }
 0xca3   :  { %1257 = vtanh.f32 %v539_v49 }
 0xcad   :  { %v1258_v50 = vpop.eup %1257 }
 0xcae   :  { %543 = vrot.lane.b32.xlu1 %v1258_v50, %s1329_s3 }
 0xd20   :  { %v544_v52 = vpop.permute.xlu1 %543 }
 0xd21   :  { %v546_v55 = vmul.f32 %v544_v52, %v541_v51  ;;  %v884_v51 = vld [vmem:[%s1596_s4] sm:$0xff]  ;;  %v885_v52 = vld [vmem:[%s1596_s4 + $0x8] sm:$0xff] }
 0xd23   :  { %v1501_v56 = vadd.f32 %v547_v54, %v546_v55  ;;  %v1216_v54 = vpack.c.bf16 %v885_v52, %v884_v51 }
 0xd25   :  { %551 = vrot.lane.b32.xlu0 %v1501_v56, %s1329_s3 }
 0xd97   :  { %v552_v57 = vpop.permute.xlu0 %551 }
 0xd98   :  { %1132 = vmatmul.mubr.msk.f32.vlgmr.msra.gmra.mrb[4].mxu1 %vm34_vm1, %v552_v57  ;;  %v886_v57 = vld [vmem:[%s1596_s4 + $0x10] sm:$0xff] }
 0xd99   :  { %1211 = vmatpush3.bf16.msra.mxu1 %v1383_v4  ;;  %1153 = vmatprep.mubr.msk.f32.mxu1 %vm1326_vm0, %v1327_v6 }
 0xd9a   :  { %1212 = vmatprep.subr.bf16.mxu1 %v1325_v3 }
 0xd9d   :  { %1214 = vmatpush3.bf16.msra.mxu1 %v1394_v7 }
 0xe6b   :  { %v621_v58 = vpop.f32.mrb[4].mxu1 }
 0xe6c   :  { %v622_v59 = vadd.f32 %v621_v58, %v1416_v9  ;;  %v1133_v60 = vpop.f32.mrb[5].mxu1  ;;  %v887_v58 = vld [vmem:[%s1596_s4 + $0x18] sm:$0xff]  ;;  %s1331_s4 = smov [#allocation4]  }
 0xe6d   :  { %v855_v60 = vrot.slane %v1444_v53, 7 }
 0xe6e   :  { %633 = vrot.lane.b32.xlu1 %v622_v59, %s1328_s11  ;;  %v625_v62 = vadd.f32 %v622_v59, %v549_v61  ;;  %v1219_v59 = vpack.c.bf16 %v887_v58, %v886_v57 }
 0xe70   :  { %v1016_v63 = vmul.f32 -1.442695, %v625_v62 }
 0xe72   :  { %1259 = vpow2.f32 %v1016_v63  ;;  %v871_v63 = vsel %vm870_vm2, %v1425_v33, %v855_v60 }
 0xe7c   :  { %v1260_v4 = vpop.eup %1259 }
 0xe7d   :  { %v629_v0 = vadd.f32 1.0, %v1260_v4  ;;  %v861_v4 = vrot.slane %v1501_v56, 4 }
 0xe7f   :  { %1261 = vrcp.f32 %v629_v0 }
 0xe89   :  { %v1262_v1 = vpop.eup %1261 }
 0xe8a   :  { %v643_v11 = vsub.f32 1.0, %v1262_v1  ;;  %v649_v13 = vmul.f32 %v1262_v1, %v1501_v56 }
 0xee0   :  { %v634_v2 = vpop.permute.xlu1 %633 }
 0xee1   :  { %v636_v5 = vmul.f32 %v1262_v1, %v634_v2 }
 0xee3   :  { %638 = vrot.lane.b32.xlu0 %v636_v5, %s1328_s11 }
 0xf55   :  { %v639_v7 = vpop.permute.xlu0 %638 }
 0xf56   :  { %v641_v8 = vadd.f32 %v639_v7, %v549_v61  ;;  %v857_v61 = vrot.slane %v1463_v14, 6 }
 0xf58   :  { %1263 = vtanh.f32 %v641_v8  ;;  %v873_v7 = vsel %vm872_vm3, %v871_v63, %v857_v61 }
 0xf62   :  { %v1264_v10 = vpop.eup %1263 }
 0xf63   :  { %645 = vrot.lane.b32.xlu1 %v1264_v10, %s1329_s3 }
 0xfd5   :  { %v646_v12 = vpop.permute.xlu1 %645 }
 0xfd6   :  { %v648_v15 = vmul.f32 %v646_v12, %v643_v11 }
 0xfd8   :  { %v1519_v16 = vadd.f32 %v649_v13, %v648_v15 }
 0xfda   :  { %653 = vrot.lane.b32.xlu0 %v1519_v16, %s1329_s3  ;;  %v863_v1 = vrot.slane %v1519_v16, 3 }
0x104c   :  { %v654_v17 = vpop.permute.xlu0 %653 }
0x104d   :  { %1143 = vmatmul.mubr.msk.f32.vlgmr.msra.gmra.mrb[6].mxu0 %vm34_vm1, %v654_v17 }
0x104e   :  { %1164 = vmatprep.mubr.msk.f32.mxu0 %vm1326_vm0, %v1327_v6  ;;  %1217 = vmatpush3.bf16.msra.mxu0 %v1216_v54 }
0x104f   :  { %1218 = vmatprep.subr.bf16.mxu0 %v1325_v3  ;;  %v859_v3 = vrot.slane %v1482_v35, 5 }
0x1051   :  { %v875_v14 = vsel %vm874_vm4, %v873_v7, %v859_v3 }
0x1052   :  { %1220 = vmatpush3.bf16.msra.mxu0 %v1219_v59  ;;  %v877_v10 = vsel %vm876_vm5, %v875_v14, %v861_v4 }
0x1053   :  { %v879_v33 = vsel %vm878_vm6, %v877_v10, %v863_v1 }
0x1120   :  { %v723_v18 = vpop.f32.mrb[6].mxu0 }
0x1121   :  { %v724_v19 = vadd.f32 %v723_v18, %v1416_v9  ;;  %v1144_v20 = vpop.f32.mrb[7].mxu0 }
0x1123   :  { %735 = vrot.lane.b32.xlu1 %v724_v19, %s1328_s11  ;;  %v727_v22 = vadd.f32 %v724_v19, %v651_v21 }
0x1125   :  { %v1018_v23 = vmul.f32 -1.442695, %v727_v22 }
0x1127   :  { %1265 = vpow2.f32 %v1018_v23 }
0x1131   :  { %v1266_v24 = vpop.eup %1265 }
0x1132   :  { %v731_v25 = vadd.f32 1.0, %v1266_v24 }
0x1134   :  { %1267 = vrcp.f32 %v731_v25 }
0x113e   :  { %v1268_v26 = vpop.eup %1267 }
0x113f   :  { %v745_v31 = vsub.f32 1.0, %v1268_v26  ;;  %v751_v34 = vmul.f32 %v1268_v26, %v1519_v16 }
0x1195   :  { %v736_v27 = vpop.permute.xlu1 %735 }
0x1196   :  { %v738_v28 = vmul.f32 %v1268_v26, %v736_v27 }
0x1198   :  { %740 = vrot.lane.b32.xlu0 %v738_v28, %s1328_s11 }
0x120a   :  { %v741_v6 = vpop.permute.xlu0 %740 }
0x120b   :  { %v743_v29 = vadd.f32 %v741_v6, %v651_v21 }
0x120d   :  { %1269 = vtanh.f32 %v743_v29 }
0x1217   :  { %v1270_v30 = vpop.eup %1269 }
0x1218   :  { %747 = vrot.lane.b32.xlu1 %v1270_v30, %s1329_s3 }
0x128a   :  { %v748_v32 = vpop.permute.xlu1 %747 }
0x128b   :  { %v750_v36 = vmul.f32 %v748_v32, %v745_v31 }
0x128d   :  { %v752_v37 = vadd.f32 %v751_v34, %v750_v36 }
0x128f   :  { %755 = vrot.lane.b32.xlu0 %v752_v37, %s1329_s3  ;;  %v865_v53 = vrot.slane %v752_v37, 2 }
0x1291   :  { %v881_v56 = vsel %vm880_vm7, %v879_v33, %v865_v53 }
0x1301   :  { %v756_v38 = vpop.permute.xlu0 %755 }
0x1302   :  { %1154 = vmatmul.mubr.msk.f32.vlgmr.msra.gmra.mrb[6].mxu1 %vm34_vm1, %v756_v38 }
0x13d5   :  { %v825_v39 = vpop.f32.mrb[6].mxu1 }
0x13d6   :  { %v826_v40 = vadd.f32 %v825_v39, %v1416_v9  ;;  %v1155_v41 = vpop.f32.mrb[7].mxu1 }
0x13d8   :  { %837 = vrot.lane.b32.xlu1 %v826_v40, %s1328_s11  ;;  %v829_v43 = vadd.f32 %v826_v40, %v753_v42 }
0x13da   :  { %v1020_v44 = vmul.f32 -1.442695, %v829_v43 }
0x13dc   :  { %1271 = vpow2.f32 %v1020_v44 }
0x13e6   :  { %v1272_v45 = vpop.eup %1271 }
0x13e7   :  { %v833_v46 = vadd.f32 1.0, %v1272_v45 }
0x13e9   :  { %1273 = vrcp.f32 %v833_v46 }
0x13f3   :  { %v1274_v47 = vpop.eup %1273 }
0x13f4   :  { %v847_v62 = vsub.f32 1.0, %v1274_v47  ;;  %v853_v2 = vmul.f32 %v1274_v47, %v752_v37 }
0x144a   :  { %v838_v48 = vpop.permute.xlu1 %837 }
0x144b   :  { %v840_v49 = vmul.f32 %v1274_v47, %v838_v48 }
0x144d   :  { %842 = vrot.lane.b32.xlu0 %v840_v49, %s1328_s11  ;;  %s993_s11 = sshll.u32 %s1331_s4, 4  ;;  %s994_s11 = int_to_ptr.vmem [resolvable:$true] %s993_s11 }
0x144e   :  { %s1277_s12 = scalar_lea.vmem %s994_s11, 16  ;;  %s1281_s13 = scalar_lea.vmem %s994_s11, 32 }
0x144f   :  { %p1278_p0 = scmp.ne.s32.totalorder %s994_s11, %s1277_s12  ;;  %p1282_p1 = scmp.lt.s32.totalorder %s994_s11, %s994_s11 }
0x1450   :  { %p1283_p2 = scmp.lt.s32.totalorder %s1281_s13, %s1277_s12 }
0x1452   :  { %p1284_p3 = por %p1283_p2, %p1282_p1 }
0x1454   :  { %p1285_p4 = pnand %p1284_p3, %p1278_p0 }
0x14bf   :  { %v843_v50 = vpop.permute.xlu0 %842 }
0x14c0   :  { %v845_v9 = vadd.f32 %v843_v50, %v753_v42 }
0x14c2   :  { %1275 = vtanh.f32 %v845_v9 }
0x14cc   :  { %v1276_v55 = vpop.eup %1275 }
0x14cd   :  { %849 = vrot.lane.b32.xlu1 %v1276_v55, %s1329_s3 }
0x153f   :  { %v850_v0 = vpop.permute.xlu1 %849 }
0x1540   :  { %v852_v5 = vmul.f32 %v850_v0, %v847_v62 }
0x1542   :  { %v854_v8 = vadd.f32 %v853_v2, %v852_v5 }
0x1544   :  { %v868_v35 = vrot.slane %v854_v8, 1  ;;  %972 = vrot.lane.b32.xlu1 %v854_v8, %s1329_s3 }
0x1546   :  { %v883_v11 = vsel %vm882_vm8, %v881_v56, %v868_v35 }
0x1547   :  { %896 = vrot.lane.b32.xlu0 %v883_v11, %s1329_s3 }
0x15b6   :  { %v973_v12 = vpop.permute.xlu1 %972 }
0x15b7   :  { %976 = vst.msk [vmem:[#allocation4] sm:$0x1] %vm975_vm9, %v973_v12 }
0x15b9   :  { %v897_v13 = vpop.permute.xlu0 %896 }
0x15ba   :  { %1165 = vmatmul.mubr.msk.f32.vlgmr.msra.gmra.mrb[8].mxu0 %vm34_vm1, %v897_v13 }
0x15bb   :  { %1288 = shalt.err (!%p1285_p4)
}
0x15bc   :  { %s1289_s3 = scalar_lea.hbm %s1599_s7, 16 }
0x15bd   :  { %p1290_p5 = scmp.ne.s32.totalorder %s1599_s7, %s1289_s3  ;;  %p1293_p6 = scmp.lt.u32.totalorder %s1289_s3, %s1599_s7 }
0x15bf   :  { %p1295_p7 = pnand %p1293_p6, %p1290_p5 }
0x15c1   :  { %1298 = shalt.err (!%p1295_p7)
}
0x15c2   :  { %996 = dma.vmem_to_hbm [thread:$0]  %s994_s11, 16, %s1599_s7, [#allocation5]   ;;  %v1021_v15 = vld [vmem:[%s1597_s5] ss:$0 sm:$0xff]  ;;  %vm970_vm10 = vcmask 130048  }
0x15c3   :  { %s1332_s24 = smov [#allocation2]  }
0x15c4   :  { %s983_s25 = sshll.u32 %s1332_s24, 4  ;;  %s984_s25 = int_to_ptr.vmem [resolvable:$true] %s983_s25 }
0x15c5   :  { %s1299_s26 = scalar_lea.vmem %s984_s25, 128  ;;  %p1304_p9 = scmp.lt.s32.totalorder %s984_s25, %s984_s25 }
0x15c6   :  { %p1300_p8 = scmp.ne.s32.totalorder %s984_s25, %s1299_s26  ;;  %p1305_p10 = scmp.lt.s32.totalorder %s1299_s26, %s1299_s26 }
0x15c8   :  { %p1306_p11 = por %p1305_p10, %p1304_p9 }
0x15ca   :  { %p1307_p12 = pnand %p1306_p11, %p1300_p8 }
0x168d   :  { %v966_v16 = vpop.f32.mrb[8].mxu0 }
0x168e   :  { %v967_v17 = vadd.f32 %v1021_v15, %v966_v16  ;;  %v1166_v18 = vpop.f32.mrb[9].mxu0 }
0x1690   :  { %971 = vst.msk [vmem:[#allocation2] sm:$0xff] %vm970_vm10, %v967_v17 }
0x1691   :  { %1310 = shalt.err (!%p1307_p12)
}
0x1692   :  { %s1311_s28 = scalar_lea.hbm %s1598_s6, 128 }
0x1693   :  { %p1312_p13 = scmp.ne.s32.totalorder %s1598_s6, %s1311_s28  ;;  %p1315_p0 = scmp.lt.u32.totalorder %s1311_s28, %s1598_s6 }
0x1695   :  { %p1317_p1 = pnand %p1315_p0, %p1312_p13 }
0x1697   :  { %1320 = shalt.err (!%p1317_p1)
}
0x1698   :  { %986 = dma.vmem_to_hbm [thread:$0]  %s984_s25, 128, %s1598_s6, [#allocation3]  }
0x1699   :  { %1321 = dma.done.wait [#allocation3], 128  }
0x169a   :  { %1322 = vsyncadd [#allocation3], 4294967168 }
0x169b   :  { %1323 = dma.done.wait [#allocation5], 16  }
0x169c   :  { %1324 = vsyncadd [#allocation5], 4294967280 }
0x169d   :  { %1003 = vsyncpa [#allocation3], 1 }
0x169e   :  { %1004 = vsyncpa [#allocation5], 1 }

</bundles_post_ra>
